<compile_context>
chip_gen: v6e
topology: v6e:2x2x1
jax: 0.10.0
libtpu: 0.0.40
codegen_flags: <defaults>
</compile_context>

<pallas_src>
import functools

import jax
import jax.numpy as jnp
from jax.experimental import pallas as pl
from jax.experimental.pallas import tpu as pltpu

_MIB = 1024 * 1024


def _round_up(x, n):
    return ((x + n - 1) // n) * n


@functools.lru_cache(maxsize=1)
def _device_config():
    """Per-chip tile defaults and the VMEM budget we allow ourselves."""
    kind = ""
    try:
        kind = jax.devices()[0].device_kind.lower()
    except Exception:
        pass
    if "v6" in kind:                                   # v6e: 128 MiB VMEM
        return dict(block_rows=1024, block_ff=1024, vmem_cap=110 * _MIB)
    if "v5 lite" in kind or "v5e" in kind or "v5litepod" in kind:
        return dict(block_rows=384, block_ff=1024, vmem_cap=110 * _MIB)
    if "v7" in kind or "tpu7" in kind or "7x" in kind:  # v7x: 64 MiB VMEM
        return dict(block_rows=512, block_ff=1024, vmem_cap=52 * _MIB)
    # Unknown chip: conservative defaults that also fit a 64 MiB VMEM core.
    return dict(block_rows=512, block_ff=1024, vmem_cap=48 * _MIB)


# ---------------------------------------------------------------------------
# Kernels. grid = (M tiles, F tiles); F (axis 1) is a streamed reduction.
#   x_ref:  (TM, Hp)   bf16 row tile of flattened tokens
#   w1_ref: (Hp, TF), b1_ref: (1, TF)   F-chunk of linear1
#   w2_ref: (TF, Hp), b2_ref: (1, Hp)   F-chunk of linear2
# ---------------------------------------------------------------------------
def _ffn_kernel_fused_out(x_ref, w1_ref, b1_ref, w2_ref, b2_ref, o_ref):
    """f32 output: accumulate straight into o_ref (resident across F axis)."""
    k = pl.program_id(1)

    @pl.when(k == 0)
    def _init():
        o_ref[...] = jnp.zeros_like(o_ref)

    h = jnp.dot(x_ref[...], w1_ref[...], preferred_element_type=jnp.float32)
    h = jnp.maximum(h + b1_ref[...], 0.0)
    # dropout == identity (eval mode)
    o_ref[...] += jnp.dot(h.astype(w2_ref.dtype), w2_ref[...],
                          preferred_element_type=jnp.float32)

    @pl.when(k == pl.num_programs(1) - 1)
    def _finalize():
        o_ref[...] += b2_ref[...]


def _ffn_kernel_scratch_acc(x_ref, w1_ref, b1_ref, w2_ref, b2_ref, o_ref,
                            acc_ref):
    """Non-f32 output (e.g. bf16): f32 accumulator scratch, cast at the end."""
    k = pl.program_id(1)

    @pl.when(k == 0)
    def _init():
        acc_ref[...] = jnp.zeros_like(acc_ref)

    h = jnp.dot(x_ref[...], w1_ref[...], preferred_element_type=jnp.float32)
    h = jnp.maximum(h + b1_ref[...], 0.0)
    acc_ref[...] += jnp.dot(h.astype(w2_ref.dtype), w2_ref[...],
                            preferred_element_type=jnp.float32)

    @pl.when(k == pl.num_programs(1) - 1)
    def _finalize():
        o_ref[...] = (acc_ref[...] + b2_ref[...]).astype(o_ref.dtype)


# ---------------------------------------------------------------------------
# Wrappers
# ---------------------------------------------------------------------------
def prepare_params(w1, b1, w2, b2, *, compute_dtype=jnp.bfloat16):
    """Pad + cast the FeedForward weights ONCE (hoisted out of the hot path).

    w1: (hidden, ff), b1: (ff,), w2: (ff, hidden), b2: (hidden,)
    (PyTorch nn.Linear stores (out, in); transpose when converting.)
    Zero padding is inert through both matmuls + ReLU (b1 pad is 0, so
    relu(bias) through zero W2 rows vanishes) — preserve this invariant.
    """
    hidden, ff = w1.shape
    hp = _round_up(hidden, 128)
    fp = _round_up(ff, 128)
    w1p = jnp.pad(w1, ((0, hp - hidden), (0, fp - ff))).astype(compute_dtype)
    b1p = jnp.pad(b1.reshape(1, ff), ((0, 0), (0, fp - ff))).astype(jnp.float32)
    w2p = jnp.pad(w2, ((0, fp - ff), (0, hp - hidden))).astype(compute_dtype)
    b2p = jnp.pad(b2.reshape(1, hidden),
                  ((0, 0), (0, hp - hidden))).astype(jnp.float32)
    return dict(w1=w1p, b1=b1p, w2=w2p, b2=b2p,
                hidden=hidden, ff=ff, hp=hp, fp=fp)


@functools.partial(
    jax.jit,
    static_argnames=("hidden", "block_rows", "block_ff", "vmem_cap_bytes"))
def _feed_forward_impl(x, w1p, b1p, w2p, b2p, *, hidden, block_rows, block_ff,
                       vmem_cap_bytes):
    hp, fp = w1p.shape
    out_dtype = x.dtype
    out_itemsize = jnp.dtype(out_dtype).itemsize
    lead_shape = x.shape[:-1]
    m = 1
    for d in lead_shape:
        m *= int(d)
    mp0 = _round_up(max(m, 8), 8)

    use_fused_out = (out_dtype == jnp.float32)

    def footprint(tm_, tf_):
        x_b = 2 * tm_ * hp * 2                   # x tile (bf16), double buffered
        w_b = 2 * (hp * tf_ + tf_ * hp) * 2      # W1 + W2 chunks (bf16), x2 bufs
        o_b = 2 * tm_ * hp * out_itemsize        # output tile, double buffered
        acc_b = 0 if use_fused_out else tm_ * hp * 4
        h_b = tm_ * tf_ * (4 + 2)                # f32 intermediate + bf16 cast
        bias = 2 * (tf_ + hp) * 4
        return x_b + w_b + o_b + acc_b + h_b + bias

    # --- F chunk: fully VMEM-resident weights (single F step) when they fit
    # comfortably -> weights stream from HBM exactly once per call.
    if 4 * hp * fp * 2 <= vmem_cap_bytes // 2:
        tf = fp
    else:
        tf = min(_round_up(block_ff, 128), fp)
    while fp % tf != 0:
        tf -= 128

    # --- row tile: as large as the VMEM budget allows.
    tm = min(_round_up(block_rows, 8), mp0)
    while footprint(tm, tf) > vmem_cap_bytes and tm > 256:
        tm = max(256, _round_up(tm // 2, 8))
    while footprint(tm, tf) > vmem_cap_bytes and tf > 512:
        tf -= 128
        while fp % tf != 0:
            tf -= 128
    while footprint(tm, tf) > vmem_cap_bytes and tm > 8:
        tm = max(8, _round_up(tm // 2, 8))

    n_f = fp // tf
    # >= 2 M tiles when weights are resident (no re-streaming cost), so the
    # parallel M axis can shard across TensorCores / pipeline x-tile DMA.
    if n_f == 1 and mp0 >= 16 and pl.cdiv(mp0, tm) < 2:
        tm = _round_up(pl.cdiv(mp0, 2), 8)
    mp = _round_up(mp0, tm)
    grid = (mp // tm, n_f)

    # Activations: pad + cast per call (small vs. weights).
    x2d = jnp.pad(x.reshape(m, x.shape[-1]),
                  ((0, mp - m), (0, hp - x.shape[-1]))).astype(w1p.dtype)

    weight_streams = grid[0] if n_f > 1 else 1
    cost = pl.CostEstimate(
        flops=4 * mp * hp * fp,
        transcendentals=0,
        bytes_accessed=int(mp * hp * 2 + mp * hp * out_itemsize
                           + weight_streams * 2 * hp * fp * 2),
    )
    vmem_limit = int(min(vmem_cap_bytes,
                         max(32 * _MIB, 2 * footprint(tm, tf))))

    kernel = _ffn_kernel_fused_out if use_fused_out else _ffn_kernel_scratch_acc
    scratch = [] if use_fused_out else [pltpu.VMEM((tm, hp), jnp.float32)]

    out = pl.pallas_call(
        kernel,
        out_shape=jax.ShapeDtypeStruct((mp, hp), out_dtype),
        grid_spec=pltpu.PrefetchScalarGridSpec(
            num_scalar_prefetch=0,
            grid=grid,
            in_specs=[
                pl.BlockSpec((tm, hp), lambda i, k: (i, 0)),   # x row tile
                pl.BlockSpec((hp, tf), lambda i, k: (0, k)),   # W1 F-chunk
                pl.BlockSpec((1, tf), lambda i, k: (0, k)),    # b1 F-chunk
                pl.BlockSpec((tf, hp), lambda i, k: (k, 0)),   # W2 F-chunk
                pl.BlockSpec((1, hp), lambda i, k: (0, 0)),    # b2
            ],
            out_specs=pl.BlockSpec((tm, hp), lambda i, k: (i, 0)),
            scratch_shapes=scratch,
        ),
        compiler_params=pltpu.CompilerParams(
            dimension_semantics=("parallel", "arbitrary"),
            vmem_limit_bytes=vmem_limit),
        cost_estimate=cost,
    )(x2d, w1p, b1p, w2p, b2p)

    return out[:m, :hidden].reshape(*lead_shape, hidden)


def feed_forward(x, params, *, block_rows=None, block_ff=None):
    """x: (..., hidden) -> (..., hidden). `params` from prepare_params()."""
    cfg = _device_config()
    if block_rows is None:
        block_rows = cfg["block_rows"]
    if block_ff is None:
        block_ff = cfg["block_ff"]
    return _feed_forward_impl(
        x, params["w1"], params["b1"], params["w2"], params["b2"],
        hidden=params["hidden"], block_rows=int(block_rows),
        block_ff=int(block_ff), vmem_cap_bytes=int(cfg["vmem_cap"]))


def init_params(key, hidden_dim, feed_forward_dim, dtype=jnp.float32):
    """Deterministic init mirroring nn.Linear (uniform(-1/sqrt(fan_in), ...))."""
    k1, k2, k3, k4 = jax.random.split(key, 4)
    lim1 = 1.0 / jnp.sqrt(hidden_dim)
    lim2 = 1.0 / jnp.sqrt(feed_forward_dim)
    # Stored as (in, out): kernel does x @ W (same math as PyTorch x @ W.T).
    w1 = jax.random.uniform(k1, (hidden_dim, feed_forward_dim), dtype,
                            minval=-lim1, maxval=lim1)
    b1 = jax.random.uniform(k2, (feed_forward_dim,), dtype,
                            minval=-lim1, maxval=lim1)
    w2 = jax.random.uniform(k3, (feed_forward_dim, hidden_dim), dtype,
                            minval=-lim2, maxval=lim2)
    b2 = jax.random.uniform(k4, (hidden_dim,), dtype,
                            minval=-lim2, maxval=lim2)
    return w1, b1, w2, b2


if __name__ == "__main__":
    batch, seq, hidden_dim, feed_forward_dim = 2, 8, 32, 64

    key = jax.random.PRNGKey(0)
    kx, kp = jax.random.split(key)
    x = jax.random.normal(kx, (batch, seq, hidden_dim), jnp.float32)
    w1, b1, w2, b2 = init_params(kp, hidden_dim, feed_forward_dim)

    # Pad + bf16-cast the weights ONCE, outside the hot path.
    params = prepare_params(w1, b1, w2, b2)

    y = feed_forward(x, params)
    jax.block_until_ready(y)
    assert y.shape == (batch, seq, hidden_dim)

    # Reference with the same bf16-input / f32-accumulate precision choice.
    xb = x.astype(jnp.bfloat16).astype(jnp.float32)
    w1b = w1.astype(jnp.bfloat16).astype(jnp.float32)
    w2b = w2.astype(jnp.bfloat16).astype(jnp.float32)
    h = jnp.maximum(xb @ w1b + b1, 0.0)
    ref_bf16 = h.astype(jnp.bfloat16).astype(jnp.float32) @ w2b + b2
    assert jnp.allclose(y, ref_bf16, atol=5e-3, rtol=5e-3)

    # Also sanity-check against the full-f32 reference within bf16 tolerance.
    ref_f32 = jnp.maximum(x @ w1 + b1, 0.0) @ w2 + b2
    assert jnp.allclose(y, ref_f32, atol=5e-2, rtol=5e-2)

    print("KERNEL_OK")
</pallas_src>

<mosaic_0001>
module attributes {stable_mosaic.version = 11 : i64} {
  func.func @_ffn_kernel_fused_out(%arg0: i32, %arg1: i32, %arg2: memref<8x128xbf16, #tpu.memory_space<vmem>>, %arg3: memref<128x128xbf16, #tpu.memory_space<vmem>>, %arg4: memref<1x128xf32, #tpu.memory_space<vmem>>, %arg5: memref<128x128xbf16, #tpu.memory_space<vmem>>, %arg6: memref<1x128xf32, #tpu.memory_space<vmem>>, %arg7: memref<8x128xf32, #tpu.memory_space<vmem>>) attributes {dimension_semantics = [#tpu.dimension_semantics<parallel>, #tpu.dimension_semantics<arbitrary>], iteration_bounds = array<i64: 2, 1>, scalar_prefetch = 0 : i64, scratch_operands = 0 : i64, tpu.core_type = #tpu.core_type<tc>, window_params = [{transform_indices = @transform_0, window_bounds = array<i64: 8, 128>}, {transform_indices = @transform_1, window_bounds = array<i64: 128, 128>}, {transform_indices = @transform_2, window_bounds = array<i64: 1, 128>}, {transform_indices = @transform_3, window_bounds = array<i64: 128, 128>}, {pipeline_mode = #tpu.pipeline_mode<synchronous>, transform_indices = @transform_4, window_bounds = array<i64: 1, 128>}, {transform_indices = @transform_5, window_bounds = array<i64: 8, 128>}]} {
    %c0_i32 = arith.constant 0 : i32
    %0 = arith.cmpi eq, %arg1, %c0_i32 : i32
    %1 = arith.extui %0 : i1 to i32
    %c0_i32_0 = arith.constant 0 : i32
    %2 = arith.cmpi ne, %1, %c0_i32_0 : i32
    scf.if %2 {
      %cst_16 = arith.constant 0.000000e+00 : f32
      %20 = vector.broadcast %cst_16 : f32 to vector<8x128xf32>
      %c0_17 = arith.constant 0 : index
      %c0_18 = arith.constant 0 : index
      %21 = vector.load %arg7[%c0_17, %c0_18] : memref<8x128xf32, #tpu.memory_space<vmem>>, vector<8x128xf32>
      tpu.vector_store %arg7[%c0_17, %c0_18], %20 {strides = array<i32>} : memref<8x128xf32, #tpu.memory_space<vmem>>, vector<8x128xf32>,
    } else {
    }
    %c0 = arith.constant 0 : index
    %c0_1 = arith.constant 0 : index
    %3 = vector.load %arg2[%c0, %c0_1] : memref<8x128xbf16, #tpu.memory_space<vmem>>, vector<8x128xbf16>
    %c0_2 = arith.constant 0 : index
    %c0_3 = arith.constant 0 : index
    %4 = vector.load %arg3[%c0_2, %c0_3] : memref<128x128xbf16, #tpu.memory_space<vmem>>, vector<128x128xbf16>
    %cst = arith.constant dense<0.000000e+00> : vector<8x128xf32>
    %5 = tpu.matmul %3, %4, %cst {dimension_numbers = #tpu.dot_dimension_numbers<[1], [0], [0], [1], [0, 0, 1, 1], [], []>} : vector<8x128xbf16>, vector<128x128xbf16>, vector<8x128xf32> -> vector<8x128xf32>
    %c0_4 = arith.constant 0 : index
    %c0_5 = arith.constant 0 : index
    %6 = vector.load %arg4[%c0_4, %c0_5] : memref<1x128xf32, #tpu.memory_space<vmem>>, vector<1x128xf32>
    %7 = vector.broadcast %6 : vector<1x128xf32> to vector<8x128xf32>
    %8 = arith.addf %5, %7 : vector<8x128xf32>
    %cst_6 = arith.constant 0.000000e+00 : f32
    %9 = vector.broadcast %cst_6 : f32 to vector<8x128xf32>
    %10 = arith.maximumf %8, %9 : vector<8x128xf32>
    %c0_7 = arith.constant 0 : index
    %c0_8 = arith.constant 0 : index
    %11 = vector.load %arg7[%c0_7, %c0_8] : memref<8x128xf32, #tpu.memory_space<vmem>>, vector<8x128xf32>
    %12 = arith.truncf %10 : vector<8x128xf32> to vector<8x128xbf16>
    %c0_9 = arith.constant 0 : index
    %c0_10 = arith.constant 0 : index
    %13 = vector.load %arg5[%c0_9, %c0_10] : memref<128x128xbf16, #tpu.memory_space<vmem>>, vector<128x128xbf16>
    %cst_11 = arith.constant dense<0.000000e+00> : vector<8x128xf32>
    %14 = tpu.matmul %12, %13, %cst_11 {dimension_numbers = #tpu.dot_dimension_numbers<[1], [0], [0], [1], [0, 0, 1, 1], [], []>} : vector<8x128xbf16>, vector<128x128xbf16>, vector<8x128xf32> -> vector<8x128xf32>
    %15 = arith.addf %11, %14 : vector<8x128xf32>
    %c0_12 = arith.constant 0 : index
    %c0_13 = arith.constant 0 : index
    %16 = vector.load %arg7[%c0_12, %c0_13] : memref<8x128xf32, #tpu.memory_space<vmem>>, vector<8x128xf32>
    tpu.vector_store %arg7[%c0_12, %c0_13], %15 {strides = array<i32>} : memref<8x128xf32, #tpu.memory_space<vmem>>, vector<8x128xf32>,
    %c0_i32_14 = arith.constant 0 : i32
    %17 = arith.cmpi eq, %arg1, %c0_i32_14 : i32
    %18 = arith.extui %17 : i1 to i32
    %c0_i32_15 = arith.constant 0 : i32
    %19 = arith.cmpi ne, %18, %c0_i32_15 : i32
    scf.if %19 {
      %c0_16 = arith.constant 0 : index
      %c0_17 = arith.constant 0 : index
      %20 = vector.load %arg7[%c0_16, %c0_17] : memref<8x128xf32, #tpu.memory_space<vmem>>, vector<8x128xf32>
      %c0_18 = arith.constant 0 : index
      %c0_19 = arith.constant 0 : index
      %21 = vector.load %arg6[%c0_18, %c0_19] : memref<1x128xf32, #tpu.memory_space<vmem>>, vector<1x128xf32>
      %22 = vector.broadcast %21 : vector<1x128xf32> to vector<8x128xf32>
      %23 = arith.addf %20, %22 : vector<8x128xf32>
      %c0_20 = arith.constant 0 : index
      %c0_21 = arith.constant 0 : index
      %24 = vector.load %arg7[%c0_20, %c0_21] : memref<8x128xf32, #tpu.memory_space<vmem>>, vector<8x128xf32>
      tpu.vector_store %arg7[%c0_20, %c0_21], %23 {strides = array<i32>} : memref<8x128xf32, #tpu.memory_space<vmem>>, vector<8x128xf32>,
    } else {
    }
    return
  }
  func.func @transform_0(%arg0: i32, %arg1: i32) -> (i32, i32) {
    %c0_i32 = arith.constant 0 : i32
    %c0_i32_0 = arith.constant 0 : i32
    return %arg0, %c0_i32 : i32, i32
  }
  func.func @transform_1(%arg0: i32, %arg1: i32) -> (i32, i32) {
    %c0_i32 = arith.constant 0 : i32
    %c0_i32_0 = arith.constant 0 : i32
    return %c0_i32, %arg1 : i32, i32
  }
  func.func @transform_2(%arg0: i32, %arg1: i32) -> (i32, i32) {
    %c0_i32 = arith.constant 0 : i32
    %c0_i32_0 = arith.constant 0 : i32
    return %c0_i32, %arg1 : i32, i32
  }
  func.func @transform_3(%arg0: i32, %arg1: i32) -> (i32, i32) {
    %c0_i32 = arith.constant 0 : i32
    %c0_i32_0 = arith.constant 0 : i32
    return %arg1, %c0_i32 : i32, i32
  }
  func.func @transform_4(%arg0: i32, %arg1: i32) -> (i32, i32) {
    %c0_i32 = arith.constant 0 : i32
    %c0_i32_0 = arith.constant 0 : i32
    %c0_i32_1 = arith.constant 0 : i32
    return %c0_i32, %c0_i32_0 : i32, i32
  }
  func.func @transform_5(%arg0: i32, %arg1: i32) -> (i32, i32) {
    %c0_i32 = arith.constant 0 : i32
    %c0_i32_0 = arith.constant 0 : i32
    return %arg0, %c0_i32 : i32, i32
  }
}

</mosaic_0001>

<bundles_post_ra>
// kernel: _feed_forward_impl.1
= control target key start
LH: loop header
LB: loop body
LE: loop exit
PB: predicated region body
PF: predicated region fallthrough
CT: control target
= control target key end

     0   :  { %10 = vsyncpa [#allocation3], 0  ;;  %s999_s0 = inlined_call_operand.vmem [shape: bf16[16,128], index: 0, kind: input, shape index: {}]   ;;  %s1000_s1 = inlined_call_operand.hbm [shape: bf16[128,128], index: 1, kind: input, shape index: {}]   ;;  %s1001_s2 = inlined_call_operand.vmem [shape: f32[1,128], index: 2, kind: input, shape index: {}]   ;;  %s1002_s3 = inlined_call_operand.hbm [shape: bf16[128,128], index: 3, kind: input, shape index: {}]   ;;  %s1003_s4 = inlined_call_operand.vmem [shape: f32[1,128], index: 4, kind: input, shape index: {}]   ;;  %s1004_s5 = inlined_call_operand.vmem [shape: f32[16,128], index: 5, kind: output, shape index: {}]  }
   0x1   :  { %11 = vsyncpa [#allocation5], 0  ;;  %s907_s18 = smov 0   ;;  %s909_s19 = smov 0  }
   0x2   :  { %s911_s20 = smov 0  }
   0x3 LB: > { %s632_s21 = sadd.s32 4294967295, %s869_s20   ;;  %s29_s22 = sadd.s32 1, %s865_s19  ;;  %s869_s20 = sphi %s911_s20, %s17_s20   ;;  %s865_s19 = sphi %s909_s19, %s1009_s19   ;;  %s861_s18 = sphi %s907_s18, %s1008_s18  }
   0x4   : > { %p31_p0 = scmp.ge.s32.totalorder %s29_s22, 2  ;;  %p634_p1 = scmp.ge.s32.totalorder %s869_s20, 1 }
   0x5   : > { %p185_p2 = scmp.lt.s32.totalorder %s869_s20, 3  ;;  %p932_p4 = scmp.eq.s32.totalorder %s632_s21, 0 }
   0x6   : > { %s1011_s22 = smov (%p31_p0, %s29_s22), 0  ;;  %s871_s25 = smov [#allocation2]  }
   0x7   : > { %p928_p3 = pnand %p634_p1, %p185_p2  ;;  %s199_s26 = sshll.u32 %s871_s25, 4  ;;  %s200_s26 = int_to_ptr.vmem [resolvable:$true] %s199_s26 }
   0x8   : > { %s872_s28 = smov [#allocation4]   ;;  %s798_s30 = scalar_lea.vmem %s200_s26, 1024 }
   0x9   : > { %p730_p5 = pneg %p928_p3  ;;  %s221_s29 = sshll.u32 %s872_s28, 4  ;;  %s222_s29 = int_to_ptr.vmem [resolvable:$true] %s221_s29 }
   0xa   : > { %p799_p8 = scmp.ne.s32.totalorder %s200_s26, %s798_s30  ;;  %p806_p11 = scmp.lt.s32.totalorder %s200_s26, %s200_s26 }
   0xb   : > { %p940_p6 = pnand %p932_p4, %p730_p5  ;;  %p807_p12 = scmp.lt.s32.totalorder %s798_s30, %s798_s30 }
   0xd   : > { %p789_p7 = pneg %p940_p6  ;;  %p808_p13 = por %p807_p12, %p806_p11 }
   0xf   : > { %p801_p9 = pnand %p799_p8, %p789_p7 }
  0x11   : > { %p802_p10 = pneg %p801_p9 }
  0x13   : > { %p809_p0 = pnand %p808_p13, %p802_p10 }
  0x15   : > { %812 = shalt.err (!%p809_p0)
}
  0x16   : > { %s873_s6 = smov 64   ;;  %s874_s7 = smov 4  }
  0x17   : > { %733 = dma.hbm_to_vmem [thread:$0]  (!%p940_p6), %s1000_s1, 1024, %s200_s26, [#allocation3], %s873_s6, %s873_s6, %s874_s7  }
  0x18   : > { %s824_s10 = scalar_lea.vmem %s222_s29, 1024  ;;  %p832_p8 = scmp.lt.s32.totalorder %s222_s29, %s222_s29 }
  0x19   : > { %p825_p1 = scmp.ne.s32.totalorder %s222_s29, %s824_s10  ;;  %p833_p9 = scmp.lt.s32.totalorder %s824_s10, %s824_s10 }
  0x1b   : > { %p827_p2 = pnand %p825_p1, %p789_p7  ;;  %p834_p11 = por %p833_p9, %p832_p8 }
  0x1d   : > { %p828_p5 = pneg %p827_p2 }
  0x1f   : > { %p835_p10 = pnand %p834_p11, %p828_p5 }
  0x21   : > { %838 = shalt.err (!%p835_p10)
}
  0x22   : > { %736 = dma.hbm_to_vmem [thread:$0]  (!%p940_p6), %s1002_s3, 1024, %s222_s29, [#allocation5], %s873_s6, %s873_s6, %s874_s7  }
  0x23   : > { %247 = sbr.rel (%p928_p3) target bundleno = 475 (0x1db), region = 40 }
  0x28   : > { %852 = dma.done.wait (%p932_p4), [#allocation3], 1024  }
  0x29   : > { %854 = vsyncadd (%p932_p4), [#allocation3], 4294966272 }
  0x2a   : > { %856 = dma.done.wait (%p932_p4), [#allocation5], 1024  }
  0x2b   : > { %858 = vsyncadd (%p932_p4), [#allocation5], 4294966272  ;;  %v875_v0 = vmov 0.0   ;;  %vm876_vm0 = vmmov 0   ;;  %v771_v1 = vld [vmem:[#allocation2 + $0x38] sm:$0xff]   ;;  %v772_v2 = vld [vmem:[#allocation2 + $0x30] sm:$0xff]  }
  0x2c   : > { %682 = vmatprep.subr.bf16.mxu0 %v875_v0  ;;  %698 = vmatprep.mubr.msk.bf16.mxu0 %vm876_vm0, %v875_v0  ;;  %v773_v3 = vld [vmem:[#allocation2 + $0x28] sm:$0xff]   ;;  %v779_v4 = vld [vmem:[#allocation4 + $0x38] sm:$0xff]   ;;  %v774_v5 = vld [vmem:[#allocation2 + $0x20] sm:$0xff]   ;;  %p280_p3 = scmp.lt.s32.totalorder %s861_s18, 1 }
  0x2d   : > { %702 = vmatprep.subr.bf16.mxu1 %v875_v0  ;;  %718 = vmatprep.mubr.msk.bf16.mxu1 %vm876_vm0, %v875_v0  ;;  %v780_v6 = vld [vmem:[#allocation4 + $0x30] sm:$0xff]   ;;  %v775_v7 = vld [vmem:[#allocation2 + $0x18] sm:$0xff]   ;;  %v781_v8 = vld [vmem:[#allocation4 + $0x28] sm:$0xff]  }
  0x2e   : > { %683 = vmatpush3.bf16.msra.mxu0 %v771_v1  ;;  %703 = vmatpush3.bf16.msra.mxu1 %v779_v4  ;;  %v776_v9 = vld [vmem:[#allocation2 + $0x10] sm:$0xff]   ;;  %v782_v10 = vld [vmem:[#allocation4 + $0x20] sm:$0xff]   ;;  %s1013_s18 = smov (!%p280_p3, %s861_s18), 1  ;;  %v777_v11 = vld [vmem:[#allocation2 + $0x8] sm:$0xff]  }
  0x2f   : > { %684 = vmatprep.subr.bf16.mxu0 %v875_v0  ;;  %704 = vmatprep.subr.bf16.mxu1 %v875_v0  ;;  %v783_v12 = vld [vmem:[#allocation4 + $0x18] sm:$0xff]   ;;  %s642_s13 = sshll.u32 %s1013_s18, 2  ;;  %v778_v13 = vld [vmem:[#allocation2] sm:$0xff]   ;;  %v784_v14 = vld [vmem:[#allocation4 + $0x10] sm:$0xff]   ;;  %s643_s23 = sshll.u32 %s1013_s18, 3 }
  0x30   : > { %s283_s16 = scalar_lea.vmem %s999_s0, %s642_s13  ;;  %v785_v16 = vld [vmem:[#allocation4 + $0x8] sm:$0xff]   ;;  %v786_v17 = vld [vmem:[#allocation4] sm:$0xff]   ;;  %s291_s28 = scalar_lea.vmem %s1004_s5, %s643_s23 }
  0x31   : > { %v298_v15 = vld [vmem:[%s283_s16] sm:$0xf] }
  0x32   : > { %685 = vmatpush3.bf16.msra.mxu0 %v772_v2  ;;  %705 = vmatpush3.bf16.msra.mxu1 %v780_v6  ;;  %v644_v18 = vld [vmem:[%s1001_s2] ss:$0 sm:$0xff] }
  0x33   : > { %686 = vmatprep.subr.bf16.mxu0 %v875_v0  ;;  %706 = vmatprep.subr.bf16.mxu1 %v875_v0  ;;  %v661_v27 = vld [vmem:[%s1003_s4] ss:$0 sm:$0xff] }
  0x36   : > { %687 = vmatpush3.bf16.msra.mxu0 %v773_v3  ;;  %707 = vmatpush3.bf16.msra.mxu1 %v781_v8 }
  0x37   : > { %688 = vmatprep.subr.bf16.mxu0 %v875_v0  ;;  %708 = vmatprep.subr.bf16.mxu1 %v875_v0 }
  0x3a   : > { %689 = vmatpush3.bf16.msra.mxu0 %v774_v5  ;;  %709 = vmatpush3.bf16.msra.mxu1 %v782_v10 }
  0x3b   : > { %690 = vmatprep.subr.bf16.mxu0 %v875_v0  ;;  %710 = vmatprep.subr.bf16.mxu1 %v875_v0 }
  0x3e   : > { %691 = vmatpush3.bf16.msra.mxu0 %v775_v7  ;;  %711 = vmatpush3.bf16.msra.mxu1 %v783_v12 }
  0x3f   : > { %692 = vmatprep.subr.bf16.mxu0 %v875_v0  ;;  %712 = vmatprep.subr.bf16.mxu1 %v875_v0 }
  0x42   : > { %693 = vmatpush3.bf16.msra.mxu0 %v776_v9  ;;  %713 = vmatpush3.bf16.msra.mxu1 %v784_v14 }
  0x43   : > { %694 = vmatprep.subr.bf16.mxu0 %v875_v0  ;;  %714 = vmatprep.subr.bf16.mxu1 %v875_v0 }
  0x46   : > { %695 = vmatpush3.bf16.msra.mxu0 %v777_v11  ;;  %715 = vmatpush3.bf16.msra.mxu1 %v785_v16 }
  0x47   : > { %696 = vmatprep.subr.bf16.mxu0 %v875_v0  ;;  %716 = vmatprep.subr.bf16.mxu1 %v875_v0 }
  0x4a   : > { %697 = vmatpush3.bf16.msra.mxu0 %v778_v13  ;;  %717 = vmatpush3.bf16.msra.mxu1 %v786_v17 }
  0x4d   : > { %699 = vmatmul.mubr.bf16.vlgmr.msra.gmra.mxu0 %v298_v15 }
 0x10d   : > { %v404_v19 = vpop.f32.mrf.mxu0 }
 0x10e   : > { %v405_v20 = vadd.f32 %v644_v18, %v404_v19 }
 0x10f   : > { %v700_v21 = vpop.f32.mrf.mxu0 }
 0x110   : > { %v410_v22 = vmax.f32 %v405_v20, 0.0 }
 0x111   : > { %v407_v23 = vpop.f32.mrf.mxu0 }
 0x112   : > { %v412_v24 = vpack.c.bf16 %v410_v22, %v410_v22 }
 0x113   : > { %v701_v25 = vpop.f32.mrf.mxu0 }
 0x114   : > { %719 = vmatmul.mubr.bf16.vlgmr.msra.gmra.mxu1 %v412_v24 }
 0x1d4   : > { %v511_v26 = vpop.f32.mrf.mxu1 }
 0x1d5   : > { %v530_v29 = vadd.f32 %v661_v27, %v511_v26 }
 0x1d6   : > { %v720_v28 = vpop.f32.mrf.mxu1 }
 0x1d7   : > { %531 = vst [vmem:[%s291_s28] sm:$0xff] %v530_v29 }
 0x1d8   : > { %v514_v30 = vpop.f32.mrf.mxu1 }
 0x1da   : > { %v721_v31 = vpop.f32.mrf.mxu1 }
 0x1db PF: > { %s17_s20 = sadd.s32 1, %s869_s20   ;;  %s1008_s18 = smov %s865_s19 }
 0x1dc   : > { %p14_p4 = scmp.ge.s32.totalorder %s17_s20, 4   ;;  %s1009_s19 = smov %s1011_s22 }
 0x1de   :  { %16 = sbr.rel (!%p14_p4) target bundleno = 3 (0x3), region = 92 }
 0x1e3   :  { %551 = vsyncpa [#allocation3], 1 }
 0x1e4   :  { %553 = vsyncpa [#allocation3 + $0x1], 1 }
 0x1e5   :  { %554 = vsyncpa [#allocation5], 1 }

</bundles_post_ra>
